<compile_context>
chip_gen: v7x
topology: tpu7x:2x2x1
jax: 0.10.0
libtpu: 0.0.40
codegen_flags: <defaults>
</compile_context>

<pallas_src>
import functools

import jax
import jax.numpy as jnp
from jax import lax
from jax.experimental import pallas as pl
from jax.experimental.pallas import tpu as pltpu

# ----------------------------- hyperparameters ------------------------------
IN_DIM = 6
HIDDEN_DIM_ENC = 32
HIDDEN_DIM = 32
OUT_DIM = 8
DEPTH_ENC = 3
DEPTH = 3
ALPHA = 0.6

N_NODES = 256                 # number of hits/nodes (test size)
FUSED = 2 * HIDDEN_DIM_ENC    # fused pixel+strip width (64)
MAX_TILE_N = 4096             # node-tile cap (lanes); keeps lane-padded inputs in VMEM budget

# dot_general dimension numbers: contract trailing dims of both operands (A @ B.T)
_NT = (((1,), (1,)), ((), ()))


# ------------------------------- kernel body --------------------------------
def _gc_kernel(x_ref, layer_ref, w_he_enc_ref, w_he_stack_ref, w_f_stack_ref,
               w_f_dec_ref, out_ref, *, alpha):
    f32 = jnp.float32
    bf16 = jnp.bfloat16
    one_m_a = 1.0 - alpha

    # ---- heterogeneous encoder entry layer (fused pixel rows 0:32 / strip 32:64)
    # x arrives node-major [tile, IN_DIM]; the NT dot_general lets the MXU absorb
    # the node->lane transpose, so no wrapper-side concat+transpose HBM pass exists.
    x_b16 = x_ref[...].astype(bf16)                                        # [tile, 6]
    h = jnp.maximum(
        lax.dot_general(w_he_enc_ref[...], x_b16, _NT,
                        preferred_element_type=f32), 0.0)                  # [64, tile] f32

    # ---- detector-layer mask: move the [tile, 1] column onto lanes with a K=1 matmul
    lay_nm = layer_ref[...].astype(f32)                                    # [tile, 1]
    lay_fm = lax.dot_general(jnp.ones((8, 1), f32), lay_nm, _NT,
                             preferred_element_type=f32)[:1, :]            # [1, tile]
    pixel_mask = lay_fm < 4.0          # gnn_tracking convention: layers 0..3 are pixel

    # ---- fused block-diagonal residual stack (ALPHA already folded into weights)
    for d in range(DEPTH_ENC - 1):                                         # static unroll
        h = jnp.maximum(
            jnp.dot(w_he_stack_ref[d], h.astype(bf16),
                    preferred_element_type=f32), 0.0) + one_m_a * h
    y = jnp.dot(w_he_stack_ref[DEPTH_ENC - 1], h.astype(bf16),
                preferred_element_type=f32)                                # [64, tile]

    # pixel/strip select + the module's relu on the encoder output
    enc = jnp.maximum(
        jnp.where(pixel_mask, y[:HIDDEN_DIM, :], y[HIDDEN_DIM:, :]), 0.0)  # [32, tile]

    # ---- final residual FCNN (ALPHA folded into hidden weights)
    h = jnp.maximum(
        jnp.dot(w_f_stack_ref[0], enc.astype(bf16),
                preferred_element_type=f32), 0.0)
    for d in range(1, DEPTH):
        h = jnp.maximum(
            jnp.dot(w_f_stack_ref[d], h.astype(bf16),
                    preferred_element_type=f32), 0.0) + one_m_a * h

    # latent_normalization folded into w_f_dec; lane-dense [OUT_DIM, tile] store
    out_ref[...] = jnp.dot(w_f_dec_ref[...], h.astype(bf16),
                           preferred_element_type=f32)


# ------------------------------ python wrapper -------------------------------
def _pick_tile(n):
    """Largest multiple-of-128 divisor of n, capped at MAX_TILE_N and (when possible)
    at n//2 so the 'parallel' grid axis has >= 2 steps (v7x has 2 TensorCores)."""
    cap = min(MAX_TILE_N, max(128, (n // 2) // 128 * 128))
    t = cap
    while t > 128 and n % t:
        t -= 128
    return t


def _block_diag(a, b):
    top = jnp.concatenate([a, jnp.zeros((a.shape[0], b.shape[1]), a.dtype)], axis=1)
    bot = jnp.concatenate([jnp.zeros((b.shape[0], a.shape[1]), b.dtype), b], axis=1)
    return jnp.concatenate([top, bot], axis=0)


def prepack_params(p):
    """One-time weight packing:
       * pixel/strip branches fused block-diagonally (one 64-wide matmul chain),
       * ALPHA folded into the residual (hidden) weights  (valid because ALPHA > 0),
       * latent_normalization folded into the final decoder,
       * everything the MXU touches cast to bf16 (kernel accumulates in f32)."""
    w_he_enc = jnp.concatenate([p["wp_enc"], p["ws_enc"]], axis=0)            # [64, IN_DIM]
    he_mats = [ALPHA * _block_diag(p["wp_hid"][d], p["ws_hid"][d])
               for d in range(DEPTH_ENC - 1)]
    he_mats.append(_block_diag(p["wp_dec"], p["ws_dec"]))                     # decoder: no alpha
    w_he_stack = jnp.stack(he_mats)                                           # [3, 64, 64]
    f_mats = [p["wf_enc"]] + [ALPHA * p["wf_hid"][d] for d in range(DEPTH - 1)]
    w_f_stack = jnp.stack(f_mats)                                             # [3, 32, 32]
    w_f_dec = p["wf_dec"] * p["latent_norm"][0, 0]                            # [8, 32]
    bf16 = jnp.bfloat16
    return (w_he_enc.astype(bf16), w_he_stack.astype(bf16),
            w_f_stack.astype(bf16), w_f_dec.astype(bf16))


def graph_construction_forward(x, layer, packed):
    """x: [N, IN_DIM] f32, layer: [N, 1] int32. Returns {'H': [N, OUT_DIM] f32}."""
    n_orig = x.shape[0]
    pad = (-n_orig) % 128
    if pad:  # padded rows are computed (as pixel hits) and sliced off below
        x = jnp.pad(x, ((0, pad), (0, 0)))
        layer = jnp.pad(layer, ((0, pad), (0, 0)))
    n = x.shape[0]
    tile_n = _pick_tile(n)
    grid = (n // tile_n,)

    w_he_enc, w_he_stack, w_f_stack, w_f_dec = packed
    kernel = functools.partial(_gc_kernel, alpha=ALPHA)

    out_fm = pl.pallas_call(
        kernel,
        out_shape=jax.ShapeDtypeStruct((OUT_DIM, n), jnp.float32),
        grid_spec=pltpu.PrefetchScalarGridSpec(
            num_scalar_prefetch=0,
            grid=grid,
            in_specs=[
                pl.BlockSpec((tile_n, IN_DIM), lambda i: (i, 0)),          # x (node-major)
                pl.BlockSpec((tile_n, 1), lambda i: (i, 0)),               # detector layer
                pl.BlockSpec((FUSED, IN_DIM), lambda i: (0, 0)),           # fused enc entry (bf16)
                pl.BlockSpec((DEPTH_ENC, FUSED, FUSED), lambda i: (0, 0, 0)),
                pl.BlockSpec((DEPTH, HIDDEN_DIM, HIDDEN_DIM), lambda i: (0, 0, 0)),
                pl.BlockSpec((OUT_DIM, HIDDEN_DIM), lambda i: (0, 0)),     # final dec (*norm)
            ],
            out_specs=pl.BlockSpec((OUT_DIM, tile_n), lambda i: (0, i)),
        ),
        compiler_params=pltpu.CompilerParams(
            dimension_semantics=("parallel",),
            vmem_limit_bytes=40 * 1024 * 1024,
        ),
        cost_estimate=pl.CostEstimate(
            flops=32_000 * n, bytes_accessed=60 * n + 32_768, transcendentals=0),
    )(x, layer, w_he_enc, w_he_stack, w_f_stack, w_f_dec)

    # Kernel stores lane-dense feature-major [8, N]; single transpose back to the
    # module's node-major contract. Downstream consumers that can ingest H
    # feature-major should take out_fm directly and skip this op.
    return {"H": out_fm[:, :n_orig].T}


# --------------------------- deterministic params ----------------------------
def _init_linear(key, fan_in, fan_out):
    # kaiming-like init; stored in PyTorch convention [out, in]
    return (jax.random.normal(key, (fan_out, fan_in), dtype=jnp.float32)
            * jnp.sqrt(2.0 / fan_in))


def make_params(key):
    keys = jax.random.split(key, 9)
    return {
        # pixel branch of the heterogeneous encoder
        "wp_enc": _init_linear(keys[0], IN_DIM, HIDDEN_DIM_ENC),
        "wp_hid": jnp.stack(
            [_init_linear(k, HIDDEN_DIM_ENC, HIDDEN_DIM_ENC)
             for k in jax.random.split(keys[1], DEPTH_ENC - 1)]),
        "wp_dec": _init_linear(keys[2], HIDDEN_DIM_ENC, HIDDEN_DIM),
        # strip branch of the heterogeneous encoder
        "ws_enc": _init_linear(keys[3], IN_DIM, HIDDEN_DIM_ENC),
        "ws_hid": jnp.stack(
            [_init_linear(k, HIDDEN_DIM_ENC, HIDDEN_DIM_ENC)
             for k in jax.random.split(keys[4], DEPTH_ENC - 1)]),
        "ws_dec": _init_linear(keys[5], HIDDEN_DIM_ENC, HIDDEN_DIM),
        # final ResFCNN
        "wf_enc": _init_linear(keys[6], HIDDEN_DIM, HIDDEN_DIM),
        "wf_hid": jnp.stack(
            [_init_linear(k, HIDDEN_DIM, HIDDEN_DIM)
             for k in jax.random.split(keys[7], DEPTH - 1)]),
        "wf_dec": _init_linear(keys[8], HIDDEN_DIM, OUT_DIM),
        # torch.nn.Parameter(torch.tensor([1.0]))
        "latent_norm": jnp.ones((1, 1), dtype=jnp.float32),
    }


# ------------------------------ references -----------------------------------
def _ref_res_fcnn(x, w_enc, w_hid, w_dec, alpha):
    h = jax.nn.relu(x @ w_enc.T)
    for d in range(w_hid.shape[0]):
        h = alpha * jax.nn.relu(h @ w_hid[d].T) + (1.0 - alpha) * h
    return h @ w_dec.T


def reference_forward_f32(x, layer, p):
    """Module semantics in plain f32 (PyTorch-equivalent math)."""
    mask = layer < 4
    h_p = _ref_res_fcnn(x, p["wp_enc"], p["wp_hid"], p["wp_dec"], ALPHA)
    h_s = _ref_res_fcnn(x, p["ws_enc"], p["ws_hid"], p["ws_dec"], ALPHA)
    enc = jax.nn.relu(jnp.where(mask, h_p, h_s))
    out = _ref_res_fcnn(enc, p["wf_enc"], p["wf_hid"], p["wf_dec"], ALPHA)
    return {"H": out * p["latent_norm"][0, 0]}


def reference_forward_packed(x, layer, packed):
    """Exact-intent reference: same packed bf16 weights, same dot boundaries."""
    f32, bf16 = jnp.float32, jnp.bfloat16
    w_he_enc, w_he_stack, w_f_stack, w_f_dec = packed
    one_m_a = 1.0 - ALPHA
    h = jax.nn.relu(jnp.dot(x.astype(bf16), w_he_enc.T, preferred_element_type=f32))
    for d in range(DEPTH_ENC - 1):
        h = jax.nn.relu(jnp.dot(h.astype(bf16), w_he_stack[d].T,
                                preferred_element_type=f32)) + one_m_a * h
    y = jnp.dot(h.astype(bf16), w_he_stack[DEPTH_ENC - 1].T, preferred_element_type=f32)
    enc = jax.nn.relu(jnp.where(layer < 4, y[:, :HIDDEN_DIM], y[:, HIDDEN_DIM:]))
    h = jax.nn.relu(jnp.dot(enc.astype(bf16), w_f_stack[0].T, preferred_element_type=f32))
    for d in range(1, DEPTH):
        h = jax.nn.relu(jnp.dot(h.astype(bf16), w_f_stack[d].T,
                                preferred_element_type=f32)) + one_m_a * h
    return jnp.dot(h.astype(bf16), w_f_dec.T, preferred_element_type=f32)


# ----------------------------------- main ------------------------------------
if __name__ == "__main__":
    key = jax.random.PRNGKey(0)
    k_x, k_layer, k_params = jax.random.split(key, 3)

    x = jax.random.normal(k_x, (N_NODES, IN_DIM), dtype=jnp.float32)
    layer = jax.random.randint(k_layer, (N_NODES, 1), 0, 8, dtype=jnp.int32)
    params = make_params(k_params)
    packed = prepack_params(params)

    fwd = jax.jit(graph_construction_forward)
    out = fwd(x, layer, packed)
    jax.block_until_ready(out["H"])
    assert out["H"].shape == (N_NODES, OUT_DIM)

    # Exact-intent check: same packed bf16 weights / same math -> tight tolerance.
    ref_b16 = reference_forward_packed(x, layer, packed)
    err_b16 = float(jnp.max(jnp.abs(out["H"] - ref_b16)))
    assert err_b16 < 2e-3, f"mismatch vs packed (bf16) reference: {err_b16}"

    # Module-semantics f32 reference: loose sanity check (bf16 MXU rounding only).
    ref_f32 = reference_forward_f32(x, layer, params)["H"]
    scale = float(jnp.max(jnp.abs(ref_f32))) + 1.0
    err_f32 = float(jnp.max(jnp.abs(out["H"] - ref_f32)))
    assert err_f32 < 0.1 * scale, f"sanity check vs f32 reference failed: {err_f32}"

    print("KERNEL_OK")
</pallas_src>

<mosaic_0001>
module attributes {stable_mosaic.version = 11 : i64} {
  func.func @_gc_kernel(%arg0: i32, %arg1: memref<128x6xf32, #tpu.memory_space<vmem>>, %arg2: memref<128x1xi32, #tpu.memory_space<vmem>>, %arg3: memref<64x6xbf16, #tpu.memory_space<vmem>>, %arg4: memref<3x64x64xbf16, #tpu.memory_space<vmem>>, %arg5: memref<3x32x32xbf16, #tpu.memory_space<vmem>>, %arg6: memref<8x32xbf16, #tpu.memory_space<vmem>>, %arg7: memref<8x128xf32, #tpu.memory_space<vmem>>) attributes {dimension_semantics = [#tpu.dimension_semantics<parallel>], iteration_bounds = array<i64: 2>, scalar_prefetch = 0 : i64, scratch_operands = 0 : i64, tpu.core_type = #tpu.core_type<tc>, window_params = [{transform_indices = @transform_0, window_bounds = array<i64: 128, 6>}, {transform_indices = @transform_1, window_bounds = array<i64: 128, 1>}, {pipeline_mode = #tpu.pipeline_mode<synchronous>, transform_indices = @transform_2, window_bounds = array<i64: 64, 6>}, {pipeline_mode = #tpu.pipeline_mode<synchronous>, transform_indices = @transform_3, window_bounds = array<i64: 3, 64, 64>}, {pipeline_mode = #tpu.pipeline_mode<synchronous>, transform_indices = @transform_4, window_bounds = array<i64: 3, 32, 32>}, {pipeline_mode = #tpu.pipeline_mode<synchronous>, transform_indices = @transform_5, window_bounds = array<i64: 8, 32>}, {transform_indices = @transform_6, window_bounds = array<i64: 8, 128>}]} {
    %c0 = arith.constant 0 : index
    %c0_0 = arith.constant 0 : index
    %0 = vector.load %arg1[%c0, %c0_0] : memref<128x6xf32, #tpu.memory_space<vmem>>, vector<128x6xf32>
    %1 = arith.truncf %0 : vector<128x6xf32> to vector<128x6xbf16>
    %c0_1 = arith.constant 0 : index
    %c0_2 = arith.constant 0 : index
    %2 = vector.load %arg3[%c0_1, %c0_2] : memref<64x6xbf16, #tpu.memory_space<vmem>>, vector<64x6xbf16>
    %cst = arith.constant dense<0.000000e+00> : vector<64x128xf32>
    %3 = tpu.matmul %2, %1, %cst {dimension_numbers = #tpu.dot_dimension_numbers<[1], [1], [0], [0], [0, 0, 1, 0], [], []>} : vector<64x6xbf16>, vector<128x6xbf16>, vector<64x128xf32> -> vector<64x128xf32>
    %cst_3 = arith.constant 0.000000e+00 : f32
    %4 = vector.broadcast %cst_3 : f32 to vector<64x128xf32>
    %5 = arith.maximumf %3, %4 : vector<64x128xf32>
    %c0_4 = arith.constant 0 : index
    %c0_5 = arith.constant 0 : index
    %6 = vector.load %arg2[%c0_4, %c0_5] : memref<128x1xi32, #tpu.memory_space<vmem>>, vector<128x1xi32>
    %7 = arith.sitofp %6 : vector<128x1xi32> to vector<128x1xf32>
    %cst_6 = arith.constant 1.000000e+00 : f32
    %8 = vector.broadcast %cst_6 : f32 to vector<8x1xf32>
    %cst_7 = arith.constant dense<0.000000e+00> : vector<8x128xf32>
    %9 = tpu.matmul %8, %7, %cst_7 {dimension_numbers = #tpu.dot_dimension_numbers<[1], [1], [0], [0], [0, 0, 1, 0], [], []>} : vector<8x1xf32>, vector<128x1xf32>, vector<8x128xf32> -> vector<8x128xf32>
    %10 = vector.extract_strided_slice %9 {offsets = [0, 0], sizes = [1, 128], strides = [1, 1]} : vector<8x128xf32> to vector<1x128xf32>
    %cst_8 = arith.constant 4.000000e+00 : f32
    %11 = vector.broadcast %cst_8 : f32 to vector<1x128xf32>
    %12 = arith.cmpf olt, %10, %11 : vector<1x128xf32>
    %c0_9 = arith.constant 0 : index
    %c0_10 = arith.constant 0 : index
    %c0_11 = arith.constant 0 : index
    %13 = vector.load %arg4[%c0_9, %c0_10, %c0_11] : memref<3x64x64xbf16, #tpu.memory_space<vmem>>, vector<1x64x64xbf16>
    %14 = vector.shape_cast %13 : vector<1x64x64xbf16> to vector<64x64xbf16>
    %15 = arith.truncf %5 : vector<64x128xf32> to vector<64x128xbf16>
    %cst_12 = arith.constant dense<0.000000e+00> : vector<64x128xf32>
    %16 = tpu.matmul %14, %15, %cst_12 {dimension_numbers = #tpu.dot_dimension_numbers<[1], [0], [0], [1], [0, 0, 1, 1], [], []>} : vector<64x64xbf16>, vector<64x128xbf16>, vector<64x128xf32> -> vector<64x128xf32>
    %cst_13 = arith.constant 0.000000e+00 : f32
    %17 = vector.broadcast %cst_13 : f32 to vector<64x128xf32>
    %18 = arith.maximumf %16, %17 : vector<64x128xf32>
    %cst_14 = arith.constant 4.000000e-01 : f32
    %19 = vector.broadcast %cst_14 : f32 to vector<64x128xf32>
    %20 = arith.mulf %19, %5 : vector<64x128xf32>
    %21 = arith.addf %18, %20 : vector<64x128xf32>
    %c1 = arith.constant 1 : index
    %c0_15 = arith.constant 0 : index
    %c0_16 = arith.constant 0 : index
    %22 = vector.load %arg4[%c1, %c0_15, %c0_16] : memref<3x64x64xbf16, #tpu.memory_space<vmem>>, vector<1x64x64xbf16>
    %23 = vector.shape_cast %22 : vector<1x64x64xbf16> to vector<64x64xbf16>
    %24 = arith.truncf %21 : vector<64x128xf32> to vector<64x128xbf16>
    %cst_17 = arith.constant dense<0.000000e+00> : vector<64x128xf32>
    %25 = tpu.matmul %23, %24, %cst_17 {dimension_numbers = #tpu.dot_dimension_numbers<[1], [0], [0], [1], [0, 0, 1, 1], [], []>} : vector<64x64xbf16>, vector<64x128xbf16>, vector<64x128xf32> -> vector<64x128xf32>
    %cst_18 = arith.constant 0.000000e+00 : f32
    %26 = vector.broadcast %cst_18 : f32 to vector<64x128xf32>
    %27 = arith.maximumf %25, %26 : vector<64x128xf32>
    %cst_19 = arith.constant 4.000000e-01 : f32
    %28 = vector.broadcast %cst_19 : f32 to vector<64x128xf32>
    %29 = arith.mulf %28, %21 : vector<64x128xf32>
    %30 = arith.addf %27, %29 : vector<64x128xf32>
    %c2 = arith.constant 2 : index
    %c0_20 = arith.constant 0 : index
    %c0_21 = arith.constant 0 : index
    %31 = vector.load %arg4[%c2, %c0_20, %c0_21] : memref<3x64x64xbf16, #tpu.memory_space<vmem>>, vector<1x64x64xbf16>
    %32 = vector.shape_cast %31 : vector<1x64x64xbf16> to vector<64x64xbf16>
    %33 = arith.truncf %30 : vector<64x128xf32> to vector<64x128xbf16>
    %cst_22 = arith.constant dense<0.000000e+00> : vector<64x128xf32>
    %34 = tpu.matmul %32, %33, %cst_22 {dimension_numbers = #tpu.dot_dimension_numbers<[1], [0], [0], [1], [0, 0, 1, 1], [], []>} : vector<64x64xbf16>, vector<64x128xbf16>, vector<64x128xf32> -> vector<64x128xf32>
    %35 = vector.extract_strided_slice %34 {offsets = [0, 0], sizes = [32, 128], strides = [1, 1]} : vector<64x128xf32> to vector<32x128xf32>
    %36 = vector.extract_strided_slice %34 {offsets = [32, 0], sizes = [32, 128], strides = [1, 1]} : vector<64x128xf32> to vector<32x128xf32>
    %37 = vector.shape_cast %12 : vector<1x128xi1> to vector<1x128xi1>
    %38 = vector.broadcast %37 : vector<1x128xi1> to vector<32x128xi1>
    %39 = arith.select %38, %35, %36 : vector<32x128xi1>, vector<32x128xf32>
    %cst_23 = arith.constant 0.000000e+00 : f32
    %40 = vector.broadcast %cst_23 : f32 to vector<32x128xf32>
    %41 = arith.maximumf %39, %40 : vector<32x128xf32>
    %c0_24 = arith.constant 0 : index
    %c0_25 = arith.constant 0 : index
    %c0_26 = arith.constant 0 : index
    %42 = vector.load %arg5[%c0_24, %c0_25, %c0_26] : memref<3x32x32xbf16, #tpu.memory_space<vmem>>, vector<1x32x32xbf16>
    %43 = vector.shape_cast %42 : vector<1x32x32xbf16> to vector<32x32xbf16>
    %44 = arith.truncf %41 : vector<32x128xf32> to vector<32x128xbf16>
    %cst_27 = arith.constant dense<0.000000e+00> : vector<32x128xf32>
    %45 = tpu.matmul %43, %44, %cst_27 {dimension_numbers = #tpu.dot_dimension_numbers<[1], [0], [0], [1], [0, 0, 1, 1], [], []>} : vector<32x32xbf16>, vector<32x128xbf16>, vector<32x128xf32> -> vector<32x128xf32>
    %cst_28 = arith.constant 0.000000e+00 : f32
    %46 = vector.broadcast %cst_28 : f32 to vector<32x128xf32>
    %47 = arith.maximumf %45, %46 : vector<32x128xf32>
    %c1_29 = arith.constant 1 : index
    %c0_30 = arith.constant 0 : index
    %c0_31 = arith.constant 0 : index
    %48 = vector.load %arg5[%c1_29, %c0_30, %c0_31] : memref<3x32x32xbf16, #tpu.memory_space<vmem>>, vector<1x32x32xbf16>
    %49 = vector.shape_cast %48 : vector<1x32x32xbf16> to vector<32x32xbf16>
    %50 = arith.truncf %47 : vector<32x128xf32> to vector<32x128xbf16>
    %cst_32 = arith.constant dense<0.000000e+00> : vector<32x128xf32>
    %51 = tpu.matmul %49, %50, %cst_32 {dimension_numbers = #tpu.dot_dimension_numbers<[1], [0], [0], [1], [0, 0, 1, 1], [], []>} : vector<32x32xbf16>, vector<32x128xbf16>, vector<32x128xf32> -> vector<32x128xf32>
    %cst_33 = arith.constant 0.000000e+00 : f32
    %52 = vector.broadcast %cst_33 : f32 to vector<32x128xf32>
    %53 = arith.maximumf %51, %52 : vector<32x128xf32>
    %cst_34 = arith.constant 4.000000e-01 : f32
    %54 = vector.broadcast %cst_34 : f32 to vector<32x128xf32>
    %55 = arith.mulf %54, %47 : vector<32x128xf32>
    %56 = arith.addf %53, %55 : vector<32x128xf32>
    %c2_35 = arith.constant 2 : index
    %c0_36 = arith.constant 0 : index
    %c0_37 = arith.constant 0 : index
    %57 = vector.load %arg5[%c2_35, %c0_36, %c0_37] : memref<3x32x32xbf16, #tpu.memory_space<vmem>>, vector<1x32x32xbf16>
    %58 = vector.shape_cast %57 : vector<1x32x32xbf16> to vector<32x32xbf16>
    %59 = arith.truncf %56 : vector<32x128xf32> to vector<32x128xbf16>
    %cst_38 = arith.constant dense<0.000000e+00> : vector<32x128xf32>
    %60 = tpu.matmul %58, %59, %cst_38 {dimension_numbers = #tpu.dot_dimension_numbers<[1], [0], [0], [1], [0, 0, 1, 1], [], []>} : vector<32x32xbf16>, vector<32x128xbf16>, vector<32x128xf32> -> vector<32x128xf32>
    %cst_39 = arith.constant 0.000000e+00 : f32
    %61 = vector.broadcast %cst_39 : f32 to vector<32x128xf32>
    %62 = arith.maximumf %60, %61 : vector<32x128xf32>
    %cst_40 = arith.constant 4.000000e-01 : f32
    %63 = vector.broadcast %cst_40 : f32 to vector<32x128xf32>
    %64 = arith.mulf %63, %56 : vector<32x128xf32>
    %65 = arith.addf %62, %64 : vector<32x128xf32>
    %c0_41 = arith.constant 0 : index
    %c0_42 = arith.constant 0 : index
    %66 = vector.load %arg6[%c0_41, %c0_42] : memref<8x32xbf16, #tpu.memory_space<vmem>>, vector<8x32xbf16>
    %67 = arith.truncf %65 : vector<32x128xf32> to vector<32x128xbf16>
    %cst_43 = arith.constant dense<0.000000e+00> : vector<8x128xf32>
    %68 = tpu.matmul %66, %67, %cst_43 {dimension_numbers = #tpu.dot_dimension_numbers<[1], [0], [0], [1], [0, 0, 1, 1], [], []>} : vector<8x32xbf16>, vector<32x128xbf16>, vector<8x128xf32> -> vector<8x128xf32>
    %c0_44 = arith.constant 0 : index
    %c0_45 = arith.constant 0 : index
    %69 = vector.load %arg7[%c0_44, %c0_45] : memref<8x128xf32, #tpu.memory_space<vmem>>, vector<8x128xf32>
    tpu.vector_store %arg7[%c0_44, %c0_45], %68 {strides = array<i32>} : memref<8x128xf32, #tpu.memory_space<vmem>>, vector<8x128xf32>,
    return
  }
  func.func @transform_0(%arg0: i32) -> (i32, i32) {
    %c0_i32 = arith.constant 0 : i32
    %c0_i32_0 = arith.constant 0 : i32
    return %arg0, %c0_i32 : i32, i32
  }
  func.func @transform_1(%arg0: i32) -> (i32, i32) {
    %c0_i32 = arith.constant 0 : i32
    %c0_i32_0 = arith.constant 0 : i32
    return %arg0, %c0_i32 : i32, i32
  }
  func.func @transform_2(%arg0: i32) -> (i32, i32) {
    %c0_i32 = arith.constant 0 : i32
    %c0_i32_0 = arith.constant 0 : i32
    %c0_i32_1 = arith.constant 0 : i32
    return %c0_i32, %c0_i32_0 : i32, i32
  }
  func.func @transform_3(%arg0: i32) -> (i32, i32, i32) {
    %c0_i32 = arith.constant 0 : i32
    %c0_i32_0 = arith.constant 0 : i32
    %c0_i32_1 = arith.constant 0 : i32
    %c0_i32_2 = arith.constant 0 : i32
    return %c0_i32, %c0_i32_0, %c0_i32_1 : i32, i32, i32
  }
  func.func @transform_4(%arg0: i32) -> (i32, i32, i32) {
    %c0_i32 = arith.constant 0 : i32
    %c0_i32_0 = arith.constant 0 : i32
    %c0_i32_1 = arith.constant 0 : i32
    %c0_i32_2 = arith.constant 0 : i32
    return %c0_i32, %c0_i32_0, %c0_i32_1 : i32, i32, i32
  }
  func.func @transform_5(%arg0: i32) -> (i32, i32) {
    %c0_i32 = arith.constant 0 : i32
    %c0_i32_0 = arith.constant 0 : i32
    %c0_i32_1 = arith.constant 0 : i32
    return %c0_i32, %c0_i32_0 : i32, i32
  }
  func.func @transform_6(%arg0: i32) -> (i32, i32) {
    %c0_i32 = arith.constant 0 : i32
    %c0_i32_0 = arith.constant 0 : i32
    return %c0_i32, %arg0 : i32, i32
  }
}

</mosaic_0001>

<bundles_post_ra>
// kernel: graph_construction_forward.1
= control target key start
LH: loop header
LB: loop body
LE: loop exit
PB: predicated region body
PF: predicated region fallthrough
CT: control target
= control target key end

     0   :  { %11 = vsyncpa [#allocation3], 0  ;;  %s2162_s0 = inlined_call_operand.vmem [shape: f32[256,6], index: 0, kind: input, shape index: {}]   ;;  %s2163_s1 = inlined_call_operand.vmem [shape: s32[256,1], index: 1, kind: input, shape index: {}]   ;;  %s2164_s2 = inlined_call_operand.vmem [shape: bf16[64,6], index: 2, kind: input, shape index: {}]   ;;  %s2165_s3 = inlined_call_operand.vmem [shape: bf16[3,64,64], index: 3, kind: input, shape index: {}]   ;;  %s2166_s4 = inlined_call_operand.vmem [shape: bf16[3,32,32], index: 4, kind: input, shape index: {}]   ;;  %s2167_s5 = inlined_call_operand.vmem [shape: bf16[8,32], index: 5, kind: input, shape index: {}]   ;;  %s2168_s6 = inlined_call_operand.hbm [shape: f32[8,256], index: 6, kind: output, shape index: {}]  }
   0x1   :  { %13 = vsyncpa [#allocation3 + $0x1], 0  ;;  %s1877_s21 = smov 0   ;;  %s1879_s22 = smov 0  }
   0x2   :  { %s1881_s23 = smov 0   ;;  %s1883_s24 = smov 0  }
   0x3 LB: > { %s1898_s25 = sadd.s32 4294967295, %s1834_s24   ;;  %s1360_s26 = sadd.s32 4294967294, %s1834_s24   ;;  %s1834_s24 = sphi %s1883_s24, %s2176_s24   ;;  %s1830_s23 = sphi %s1881_s23, %s2175_s23   ;;  %s1826_s22 = sphi %s1879_s22, %s2174_s22   ;;  %s1822_s21 = sphi %s1877_s21, %s2173_s21  }
   0x4   : > { %s1902_s27 = sadd.s32 1, %s1834_s24   ;;  %s162_s28 = sadd.s32 1, %s1830_s23 }
   0x5   : > { %s159_s29 = ssub.s32 %s1834_s24, %s1902_s27  ;;  %p172_p0 = scmp.ne.s32.totalorder %s1830_s23, %s1826_s22 }
   0x6   : > { %p160_p1 = scmp.eq.s32.totalorder %s159_s29, 0  ;;  %p173_p2 = scmp.eq.s32.totalorder %s1898_s25, 1 }
   0x7   : > { %p178_p3 = scmp.ne.s32.totalorder %s1826_s22, %s1822_s21  ;;  %p179_p4 = scmp.eq.s32.totalorder %s1360_s26, 1 }
   0x8   : > { %s1913_s30 = scalar_select %p160_p1, %s1830_s23, %s162_s28  }
   0x9   : > { %p1915_p5 = por %p173_p2, %p172_p0  ;;  %p1919_p6 = por %p179_p4, %p178_p3 }
   0xa   : > { %p1363_p7 = scmp.ge.s32.totalorder %s1834_s24, 1  ;;  %p227_p8 = scmp.lt.s32.totalorder %s1834_s24, 3 }
   0xc   : > { %p228_p9 = pnand %p1363_p7, %p227_p8 }
   0xd   : > { %s1365_s9 = sshll.u32 (!%p228_p9), %s1898_s25, 4  ;;  %v1750_v0 = vld [vmem:[%s2164_s2] sm:$0xff] (!%p228_p9)   ;;  %vm327_vm0 = vcmask (!%p228_p9), 48128   ;;  %v1751_v33 = vld [vmem:[%s2164_s2 + $0x8] sm:$0xff] (!%p228_p9)   ;;  %v1752_v34 = vld [vmem:[%s2164_s2 + $0x10] sm:$0xff] (!%p228_p9)   ;;  %vm624_vm1 = vcmask (!%p228_p9), 523264  }
   0xe   : > { %231 = sbr.rel (%p228_p9) target bundleno = 1947 (0x79b), region = 44  ;;  %p263_p10 = scmp.lt.s32.totalorder (!%p228_p9), %s1365_s9, 31  ;;  %1543 = vmatprep.mubr.msk.bf16.mxu0 (!%p228_p9), %vm327_vm0, %v1750_v0  ;;  %v1753_v35 = vld [vmem:[%s2164_s2 + $0x18] sm:$0xff] (!%p228_p9)   ;;  %v1754_v36 = vld [vmem:[%s2165_s3] sm:$0xff] (!%p228_p9)   ;;  %vm469_vm2 = vcmask (!%p228_p9), 7168   ;;  %v1836_v39 = vmov (!%p228_p9), 0.0|0.0  }
   0xf   : > { %1666 = vmatprep.subr.bf16.mxu1 (!%p228_p9), %v1836_v39  ;;  %vm1999_vm3 = vmpackc.low (!%p228_p9), %vm469_vm2, %vm469_vm2  ;;  %vm1837_vm4 = vmmov (!%p228_p9), 0   ;;  %vm1000_vm5 = vcmask (!%p228_p9), 261120   ;;  %s259_s18 = sand.u32 (!%p228_p9), 1, %s1826_s22   ;;  %s1456_s28 = sshll.u32 (!%p228_p9), %s1898_s25, 7 }
  0x10   : > { %s1364_s19 = sshll.u32 (!%p228_p9), %s259_s18, 3  ;;  %s2122_s11 = scalar_lea.hbm (!%p228_p9), %s2168_s6, %s1456_s28 }
  0x11   : > { %s261_s20 = scalar_lea.vmem (!%p228_p9), [#allocation2], %s1364_s19  ;;  %s1841_s25 = smov (!%p228_p9), [#allocation2]  }
  0x12   : > { %s1289_s26 = sshll.u32 (!%p228_p9), %s261_s20, 4  ;;  %s2117_s26 = int_to_ptr.vmem [resolvable:$true] %s1289_s26 }
  0x15   : > { %s2178_s9 = smov (!%p263_p10, %s1365_s9), 31 }
  0x16   : > { %s1366_s12 = sshll.u32 %s2178_s9, 3  ;;  %s1772_s9 = scalar_lea.vmem %s2117_s26, 128 }
  0x17   : > { %s1938_s15 = scalar_lea.vmem %s2162_s0, %s1366_s12  ;;  %s1993_s13 = scalar_lea.vmem %s2163_s1, %s1366_s12 }
  0x18   : > { %v275_v1 = vld [vmem:[%s1938_s15] sm:$0xff]  ;;  %v276_v2 = vld [vmem:[%s1938_s15 + $0x8] sm:$0xff]  ;;  %v277_v3 = vld [vmem:[%s1938_s15 + $0x10] sm:$0xff]  ;;  %p1773_p11 = scmp.ne.s32.totalorder %s2117_s26, %s1772_s9  ;;  %s1776_s12 = sshll.u32 %s1841_s25, 4  ;;  %s1777_s12 = int_to_ptr.vmem [resolvable:$false] %s1776_s12 }
  0x19   : > { %v291_v4 = vpack.c.bf16 %v276_v2, %v275_v1  ;;  %v278_v5 = vld [vmem:[%s1938_s15 + $0x18] sm:$0xff]  ;;  %v279_v8 = vld [vmem:[%s1938_s15 + $0x20] sm:$0xff]  ;;  %v280_v9 = vld [vmem:[%s1938_s15 + $0x28] sm:$0xff]  ;;  %s1778_s14 = scalar_lea.vmem %s1777_s12, 256  ;;  %p1779_p0 = scmp.lt.s32.totalorder %s2117_s26, %s1777_s12 }
  0x1a   : > { %v292_v6 = vpack.c.bf16 %v278_v5, %v277_v3  ;;  %v293_v11 = vpack.c.bf16 %v280_v9, %v279_v8  ;;  %v281_v12 = vld [vmem:[%s1938_s15 + $0x30] sm:$0xff]  ;;  %v282_v13 = vld [vmem:[%s1938_s15 + $0x38] sm:$0xff]  ;;  %v283_v16 = vld [vmem:[%s1938_s15 + $0x40] sm:$0xff]  ;;  %p1774_p12 = pnand %p1773_p11, %p1915_p5  ;;  %p1780_p1 = scmp.lt.s32.totalorder %s1778_s14, %s1772_s9 }
  0x1b   : > { %1698 = vmatprep.subr.msk.bf16.mxu0 %vm327_vm0, %v291_v4  ;;  %v341_v7 = vsel %vm327_vm0, %v291_v4, 0  ;;  %v294_v15 = vpack.c.bf16 %v282_v13, %v281_v12  ;;  %v284_v17 = vld [vmem:[%s1938_s15 + $0x48] sm:$0xff]  ;;  %v285_v20 = vld [vmem:[%s1938_s15 + $0x50] sm:$0xff]  ;;  %v286_v21 = vld [vmem:[%s1938_s15 + $0x58] sm:$0xff] }
  0x1c   : > { %1528 = vmatpush3.bf16.xpose.msra.mxu0 %v341_v7  ;;  %v344_v10 = vsel %vm327_vm0, %v292_v6, 0  ;;  %v347_v14 = vsel %vm327_vm0, %v293_v11, 0  ;;  %v295_v19 = vpack.c.bf16 %v284_v17, %v283_v16  ;;  %v296_v23 = vpack.c.bf16 %v286_v21, %v285_v20  ;;  %v287_v24 = vld [vmem:[%s1938_s15 + $0x60] sm:$0xff]  ;;  %v288_v25 = vld [vmem:[%s1938_s15 + $0x68] sm:$0xff]  ;;  %v289_v28 = vld [vmem:[%s1938_s15 + $0x70] sm:$0xff]  ;;  %p1775_p13 = pneg %p1774_p12  ;;  %p1781_p2 = por %p1780_p1, %p1779_p0 }
  0x1d   : > { %1699 = vmatprep.subr.msk.bf16.mxu0 %vm327_vm0, %v292_v6  ;;  %v350_v18 = vsel %vm327_vm0, %v294_v15, 0  ;;  %v297_v27 = vpack.c.bf16 %v288_v25, %v287_v24  ;;  %v290_v29 = vld [vmem:[%s1938_s15 + $0x78] sm:$0xff]  ;;  %v437_v37 = vld [vmem:[%s1993_s13] sm:$0xff]  ;;  %v438_v38 = vld [vmem:[%s1993_s13 + $0x8] sm:$0xff] }
  0x1e   : > { %v353_v22 = vsel %vm327_vm0, %v295_v19, 0  ;;  %v356_v26 = vsel %vm327_vm0, %v296_v23, 0  ;;  %v298_v31 = vpack.c.bf16 %v290_v29, %v289_v28  ;;  %v453_v40 = vcvt.s32.f32 %v437_v37  ;;  %v439_v43 = vld [vmem:[%s1993_s13 + $0x10] sm:$0xff]  ;;  %v440_v44 = vld [vmem:[%s1993_s13 + $0x18] sm:$0xff]  ;;  %v441_v49 = vld [vmem:[%s1993_s13 + $0x20] sm:$0xff]  ;;  %p1782_p3 = pnand %p1781_p2, %p1775_p13 }
  0x1f   : > { %v359_v30 = vsel %vm327_vm0, %v297_v27, 0  ;;  %v454_v41 = vcvt.s32.f32 %v438_v38  ;;  %v455_v46 = vcvt.s32.f32 %v439_v43  ;;  %v456_v47 = vcvt.s32.f32 %v440_v44  ;;  %v442_v50 = vld [vmem:[%s1993_s13 + $0x28] sm:$0xff]  ;;  %v443_v54 = vld [vmem:[%s1993_s13 + $0x30] sm:$0xff]  ;;  %v444_v55 = vld [vmem:[%s1993_s13 + $0x38] sm:$0xff] }
  0x20   : > { %v362_v32 = vsel %vm327_vm0, %v298_v31, 0  ;;  %v457_v51 = vcvt.s32.f32 %v441_v49  ;;  %v458_v52 = vcvt.s32.f32 %v442_v50  ;;  %v459_v56 = vcvt.s32.f32 %v443_v54  ;;  %v445_v59 = vld [vmem:[%s1993_s13 + $0x40] sm:$0xff]  ;;  %v446_v60 = vld [vmem:[%s1993_s13 + $0x48] sm:$0xff]  ;;  %v447_v0 = vld [vmem:[%s1993_s13 + $0x50] sm:$0xff] }
  0x21   : > { %v1667_v45 = vpack.c.bf16 %v454_v41, %v453_v40  ;;  %v1671_v48 = vpack.c.bf16 %v456_v47, %v455_v46  ;;  %v460_v57 = vcvt.s32.f32 %v444_v55  ;;  %v461_v61 = vcvt.s32.f32 %v445_v59  ;;  %v448_v1 = vld [vmem:[%s1993_s13 + $0x58] sm:$0xff]  ;;  %v449_v5 = vld [vmem:[%s1993_s13 + $0x60] sm:$0xff]  ;;  %v450_v6 = vld [vmem:[%s1993_s13 + $0x68] sm:$0xff] }
  0x22   : > { %v1675_v53 = vpack.c.bf16 %v458_v52, %v457_v51  ;;  %v462_v62 = vcvt.s32.f32 %v446_v60  ;;  %v463_v2 = vcvt.s32.f32 %v447_v0  ;;  %v464_v3 = vcvt.s32.f32 %v448_v1  ;;  %v1758_v40 = vld [vmem:[%s2165_s3 + $0x20] sm:$0xff]  }
  0x23   : > { %1669 = vmatpush3.bf16.xpose.msk.msra.mxu1 %vm1999_vm3, %v1667_v45  ;;  %v1679_v58 = vpack.c.bf16 %v460_v57, %v459_v56  ;;  %v465_v7 = vcvt.s32.f32 %v449_v5  ;;  %v466_v8 = vcvt.s32.f32 %v450_v6  ;;  %v1838_v38 = vmov 0.0  }
  0x24   : > { %1530 = vmatpush3.bf16.xpose.msra.mxu0 %v344_v10  ;;  %1670 = vmatprep.subr.bf16.mxu1 %v1836_v39  ;;  %v1683_v63 = vpack.c.bf16 %v462_v62, %v461_v61  ;;  %v1687_v4 = vpack.c.bf16 %v464_v3, %v463_v2 }
  0x25   : > { %1700 = vmatprep.subr.msk.bf16.mxu0 %vm327_vm0, %v293_v11  ;;  %v1691_v9 = vpack.c.bf16 %v466_v8, %v465_v7  ;;  %1583 = vmatprep.mubr.msk.f32.mxu1 %vm1837_vm4, %v1838_v38 }
  0x2b   : > { %1673 = vmatpush3.bf16.xpose.msk.msra.mxu1 %vm1999_vm3, %v1671_v48 }
  0x2c   : > { %1532 = vmatpush3.bf16.xpose.msra.mxu0 %v347_v14  ;;  %1674 = vmatprep.subr.bf16.mxu1 %v1836_v39 }
  0x2d   : > { %1701 = vmatprep.subr.msk.bf16.mxu0 %vm327_vm0, %v294_v15 }
  0x33   : > { %1677 = vmatpush3.bf16.xpose.msk.msra.mxu1 %vm1999_vm3, %v1675_v53 }
  0x34   : > { %1534 = vmatpush3.bf16.xpose.msra.mxu0 %v350_v18  ;;  %1678 = vmatprep.subr.bf16.mxu1 %v1836_v39 }
  0x35   : > { %1702 = vmatprep.subr.msk.bf16.mxu0 %vm327_vm0, %v295_v19 }
  0x3b   : > { %1681 = vmatpush3.bf16.xpose.msk.msra.mxu1 %vm1999_vm3, %v1679_v58 }
  0x3c   : > { %1536 = vmatpush3.bf16.xpose.msra.mxu0 %v353_v22  ;;  %1682 = vmatprep.subr.bf16.mxu1 %v1836_v39 }
  0x3d   : > { %1703 = vmatprep.subr.msk.bf16.mxu0 %vm327_vm0, %v296_v23 }
  0x43   : > { %1685 = vmatpush3.bf16.xpose.msk.msra.mxu1 %vm1999_vm3, %v1683_v63 }
  0x44   : > { %1538 = vmatpush3.bf16.xpose.msra.mxu0 %v356_v26  ;;  %1686 = vmatprep.subr.bf16.mxu1 %v1836_v39 }
  0x45   : > { %1704 = vmatprep.subr.msk.bf16.mxu0 %vm327_vm0, %v297_v27 }
  0x4b   : > { %1689 = vmatpush3.bf16.xpose.msk.msra.mxu1 %vm1999_vm3, %v1687_v4 }
  0x4c   : > { %1540 = vmatpush3.bf16.xpose.msra.mxu0 %v359_v30  ;;  %1690 = vmatprep.subr.bf16.mxu1 %v1836_v39  ;;  %v1755_v30 = vld [vmem:[%s2165_s3 + $0x8] sm:$0xff]  }
  0x4d   : > { %1705 = vmatprep.subr.msk.bf16.mxu0 %vm327_vm0, %v298_v31  ;;  %v1756_v31 = vld [vmem:[%s2165_s3 + $0x10] sm:$0xff]  }
  0x53   : > { %1693 = vmatpush3.bf16.xpose.msk.msra.mxu1 %vm1999_vm3, %v1691_v9 }
  0x54   : > { %1542 = vmatpush3.bf16.xpose.msra.mxu0 %v362_v32  ;;  %1694 = vmatprep.subr.bf16.mxu1 %v1836_v39  ;;  %v1757_v32 = vld [vmem:[%s2165_s3 + $0x18] sm:$0xff]   ;;  %v1839_v39 = vmov 1.0  }
  0x5b   : > { %1544 = vmatmul.mubr.msk.bf16.vlgmr.msra.gmra.mrb[0].mxu0 %vm327_vm0, %v1751_v33  ;;  %v451_v33 = vld [vmem:[%s1993_s13 + $0x70] sm:$0xff] }
  0x5c   : > { %1547 = vmatprep.mubr.msk.bf16.mxu0 %vm327_vm0, %v1752_v34  ;;  %v452_v34 = vld [vmem:[%s1993_s13 + $0x78] sm:$0xff]  ;;  %s1276_s13 = scalar_lea.sflag [#allocation3], %s259_s18 }
  0x63   : > { %1548 = vmatmul.mubr.msk.bf16.gmra.mrb[4].mxu0 %vm327_vm0, %v1753_v35  ;;  %v467_v35 = vcvt.s32.f32 %v451_v33 }
  0x64   : > { %1594 = vmatprep.mubr.msk.bf16.mxu0 %vm624_vm1, %v1754_v36  ;;  %v468_v36 = vcvt.s32.f32 %v452_v34 }
  0x66   : > { %v1695_v37 = vpack.c.bf16 %v468_v36, %v467_v35 }
  0x68   : > { %1697 = vmatpush3.bf16.xpose.msk.msra.mxu1 %vm1999_vm3, %v1695_v37 }
  0x6f   : > { %1584 = vmatmul.mubr.msk.f32.vlgmr.msra.gmra.mrb[0].mxu1 %vm469_vm2, %v1839_v39 }
  0x70   : > { %1610 = vmatprep.mubr.msk.bf16.mxu1 %vm624_vm1, %v1758_v40 }
 0x12e   : > { %v1545_v10 = vpop.f32.mrb[0].mxu0 }
 0x12f   : > { %v398_v11 = vpop.f32.mrb[1].mxu0  ;;  %v431_v13 = vmax.f32 %v1545_v10, 0.0 }
 0x130   : > { %v1546_v12 = vpop.f32.mrb[2].mxu0  ;;  %v429_v16 = vmax.f32 %v398_v11, 0.0 }
 0x131   : > { %v432_v14 = vmax.f32 %v1546_v12, 0.0  ;;  %v401_v15 = vpop.f32.mrb[3].mxu0  ;;  %v712_v43 = vmul.f32 0.4, %v431_v13 }
 0x132   : > { %v430_v17 = vmax.f32 %v401_v15, 0.0  ;;  %v710_v42 = vmul.f32 0.4, %v429_v16  ;;  %v1761_v15 = vld [vmem:[%s2165_s3 + $0x38] sm:$0xff]  }
 0x133   : > { %v601_v18 = vpack.c.bf16 %v432_v14, %v431_v13  ;;  %v713_v48 = vmul.f32 0.4, %v432_v14  ;;  %v1759_v13 = vld [vmem:[%s2165_s3 + $0x28] sm:$0xff]   ;;  %v1760_v14 = vld [vmem:[%s2165_s3 + $0x30] sm:$0xff]  }
 0x134   : > { %v600_v19 = vpack.c.bf16 %v430_v17, %v429_v16  ;;  %v711_v52 = vmul.f32 0.4, %v430_v17 }
 0x136   : > { %v1549_v20 = vpop.f32.mrb[4].mxu0  ;;  %1586 = vmatprep.subr.bf16.mxu0 %v600_v19 }
 0x137   : > { %v414_v21 = vpop.f32.mrb[5].mxu0  ;;  %1587 = vmatpush3.bf16.msra.mxu0 %v600_v19  ;;  %v435_v23 = vmax.f32 %v1549_v20, 0.0 }
 0x138   : > { %v1550_v22 = vpop.f32.mrb[6].mxu0  ;;  %1588 = vmatprep.subr.bf16.mxu0 %v601_v18  ;;  %v433_v26 = vmax.f32 %v414_v21, 0.0 }
 0x139   : > { %v436_v24 = vmax.f32 %v1550_v22, 0.0  ;;  %v417_v25 = vpop.f32.mrb[7].mxu0  ;;  %v716_v60 = vmul.f32 0.4, %v435_v23 }
 0x13a   : > { %v434_v27 = vmax.f32 %v417_v25, 0.0  ;;  %v714_v63 = vmul.f32 0.4, %v433_v26 }
 0x13b   : > { %v603_v28 = vpack.c.bf16 %v436_v24, %v435_v23  ;;  %1589 = vmatpush3.bf16.msra.mxu0 %v601_v18  ;;  %v717_v2 = vmul.f32 0.4, %v436_v24  ;;  %v1762_v18 = vld [vmem:[%s2165_s3 + $0x40] sm:$0xff]  }
 0x13c   : > { %v602_v29 = vpack.c.bf16 %v434_v27, %v433_v26  ;;  %v715_v6 = vmul.f32 0.4, %v434_v27 }
 0x13e   : > { %1590 = vmatprep.subr.bf16.mxu0 %v602_v29 }
 0x13f   : > { %1591 = vmatpush3.bf16.msra.mxu0 %v602_v29 }
 0x140   : > { %1592 = vmatprep.subr.bf16.mxu0 %v603_v28 }
 0x142   : > { %v2064_v16 = vpop.f32.mrb[0].mxu1 }
 0x143   : > { %1593 = vmatpush3.bf16.msra.mxu0 %v603_v28  ;;  %v1585_v17 = vpop.f32.mrb[1].mxu1  ;;  %vm591_vm6 = vcmp.lt.f32.partialorder %v2064_v16, 4.0 }
 0x146   : > { %1595 = vmatmul.mubr.msk.bf16.vlgmr.msra.gmra.mrb[8].mxu0 %vm624_vm1, %v1755_v30 }
 0x147   : > { %1598 = vmatprep.mubr.msk.bf16.mxu0 %vm624_vm1, %v1756_v31 }
 0x14e   : > { %1599 = vmatmul.mubr.msk.bf16.gmra.mrb[12].mxu0 %vm624_vm1, %v1757_v32 }
 0x14f   : > { %1626 = vmatprep.mubr.msk.bf16.mxu0 %vm624_vm1, %v1762_v18 }
 0x219   : > { %v1596_v41 = vpop.f32.mrb[8].mxu0 }
 0x21a   : > { %v704_v44 = vmax.f32 %v1596_v41, 0.0  ;;  %v671_v45 = vpop.f32.mrb[9].mxu0 }
 0x21b   : > { %v702_v46 = vmax.f32 %v671_v45, 0.0  ;;  %v1597_v47 = vpop.f32.mrb[10].mxu0 }
 0x21c   : > { %v720_v49 = vadd.f32 %v712_v43, %v704_v44  ;;  %v705_v50 = vmax.f32 %v1597_v47, 0.0  ;;  %v674_v51 = vpop.f32.mrb[11].mxu0 }
 0x21d   : > { %v718_v53 = vadd.f32 %v710_v42, %v702_v46  ;;  %v703_v54 = vmax.f32 %v674_v51, 0.0 }
 0x21e   : > { %v721_v55 = vadd.f32 %v713_v48, %v705_v50  ;;  %v846_v21 = vmul.f32 0.4, %v720_v49 }
 0x21f   : > { %v719_v56 = vadd.f32 %v711_v52, %v703_v54  ;;  %v844_v24 = vmul.f32 0.4, %v718_v53 }
 0x220   : > { %v736_v57 = vpack.c.bf16 %v721_v55, %v720_v49  ;;  %v847_v28 = vmul.f32 0.4, %v721_v55 }
 0x221   : > { %v1600_v58 = vpop.f32.mrb[12].mxu0  ;;  %v735_v59 = vpack.c.bf16 %v719_v56, %v718_v53  ;;  %v845_v32 = vmul.f32 0.4, %v719_v56  ;;  %v1763_v56 = vld [vmem:[%s2165_s3 + $0x48] sm:$0xff]  }
 0x222   : > { %v708_v61 = vmax.f32 %v1600_v58, 0.0  ;;  %v687_v62 = vpop.f32.mrb[13].mxu0  ;;  %v1765_v58 = vld [vmem:[%s2165_s3 + $0x58] sm:$0xff]  }
 0x223   : > { %v706_v0 = vmax.f32 %v687_v62, 0.0  ;;  %v1601_v1 = vpop.f32.mrb[14].mxu0  ;;  %1602 = vmatprep.subr.bf16.mxu1 %v735_v59 }
 0x224   : > { %v724_v3 = vadd.f32 %v716_v60, %v708_v61  ;;  %v709_v4 = vmax.f32 %v1601_v1, 0.0  ;;  %v690_v5 = vpop.f32.mrb[15].mxu0  ;;  %1603 = vmatpush3.bf16.msra.mxu1 %v735_v59  ;;  %v1766_v59 = vld [vmem:[%s2166_s4] sm:$0xff]   ;;  %v971_v60 = vlaneseq }
 0x225   : > { %v722_v7 = vadd.f32 %v714_v63, %v706_v0  ;;  %v707_v8 = vmax.f32 %v690_v5, 0.0  ;;  %1604 = vmatprep.subr.bf16.mxu1 %v736_v57  ;;  %v1840_v0 = vmov 0  }
 0x226   : > { %v725_v9 = vadd.f32 %v717_v2, %v709_v4  ;;  %v850_v40 = vmul.f32 0.4, %v724_v3  ;;  %v972_v61 = vshrl.u32 %v971_v60, 7  ;;  %v970_v1 = vsel %vm591_vm6, 1, %v1840_v0 }
 0x227   : > { %v723_v10 = vadd.f32 %v715_v6, %v707_v8  ;;  %v848_v44 = vmul.f32 0.4, %v722_v7 }
 0x228   : > { %1605 = vmatpush3.bf16.msra.mxu1 %v736_v57  ;;  %v738_v11 = vpack.c.bf16 %v725_v9, %v724_v3  ;;  %v851_v47 = vmul.f32 0.4, %v725_v9  ;;  %v1764_v57 = vld [vmem:[%s2165_s3 + $0x50] sm:$0xff]   ;;  %v973_v62 = vsub.s32 0, %v972_v61 }
 0x229   : > { %v737_v12 = vpack.c.bf16 %v723_v10, %v722_v7  ;;  %v849_v51 = vmul.f32 0.4, %v723_v10 }
 0x22a   : > { %v974_v5 = vrot.slane %v970_v1, %v973_v62 }
 0x22b   : > { %1606 = vmatprep.subr.bf16.mxu1 %v737_v12 }
 0x22c   : > { %1607 = vmatpush3.bf16.msra.mxu1 %v737_v12  ;;  %vm975_vm7 = vcmp.eq.s32.totalorder %v974_v5, 1 }
 0x22d   : > { %1608 = vmatprep.subr.bf16.mxu1 %v738_v11 }
 0x230   : > { %1609 = vmatpush3.bf16.msra.mxu1 %v738_v11 }
 0x233   : > { %1611 = vmatmul.mubr.msk.bf16.vlgmr.msra.gmra.mrb[4].mxu1 %vm624_vm1, %v1759_v13 }
 0x234   : > { %1614 = vmatprep.mubr.msk.bf16.mxu1 %vm624_vm1, %v1760_v14 }
 0x23b   : > { %1615 = vmatmul.mubr.msk.bf16.gmra.mrb[8].mxu1 %vm624_vm1, %v1761_v15 }
 0x23c   : > { %1638 = vmatprep.mubr.msk.bf16.mxu1 %vm1000_vm5, %v1766_v59 }
 0x306   : > { %v1612_v19 = vpop.f32.mrb[4].mxu1 }
 0x307   : > { %v838_v20 = vmax.f32 %v1612_v19, 0.0  ;;  %v805_v22 = vpop.f32.mrb[5].mxu1 }
 0x308   : > { %v836_v23 = vmax.f32 %v805_v22, 0.0  ;;  %v1613_v25 = vpop.f32.mrb[6].mxu1 }
 0x309   : > { %v854_v26 = vadd.f32 %v846_v21, %v838_v20  ;;  %v839_v27 = vmax.f32 %v1613_v25, 0.0  ;;  %v808_v29 = vpop.f32.mrb[7].mxu1  ;;  %v1767_v20 = vld [vmem:[%s2166_s4 + $0x8] sm:$0xff]   ;;  %v1768_v21 = vld [vmem:[%s2166_s4 + $0x10] sm:$0xff]  }
 0x30a   : > { %v852_v30 = vadd.f32 %v844_v24, %v836_v23  ;;  %v837_v31 = vmax.f32 %v808_v29, 0.0 }
 0x30b   : > { %v855_v33 = vadd.f32 %v847_v28, %v839_v27 }
 0x30c   : > { %v853_v34 = vadd.f32 %v845_v32, %v837_v31  ;;  %v1769_v32 = vld [vmem:[%s2166_s4 + $0x18] sm:$0xff]  }
 0x30d   : > { %v870_v35 = vpack.c.bf16 %v855_v33, %v854_v26  ;;  %v1770_v33 = vld [vmem:[%s2166_s4 + $0x20] sm:$0xff]  }
 0x30e   : > { %v1616_v36 = vpop.f32.mrb[8].mxu1  ;;  %v869_v37 = vpack.c.bf16 %v853_v34, %v852_v30 }
 0x30f   : > { %v842_v39 = vmax.f32 %v1616_v36, 0.0  ;;  %v821_v41 = vpop.f32.mrb[9].mxu1 }
 0x310   : > { %v840_v43 = vmax.f32 %v821_v41, 0.0  ;;  %v1617_v45 = vpop.f32.mrb[10].mxu1  ;;  %1618 = vmatprep.subr.bf16.mxu0 %v869_v37 }
 0x311   : > { %v858_v42 = vadd.f32 %v850_v40, %v842_v39  ;;  %v843_v46 = vmax.f32 %v1617_v45, 0.0  ;;  %v824_v48 = vpop.f32.mrb[11].mxu1  ;;  %1619 = vmatpush3.bf16.msra.mxu0 %v869_v37 }
 0x312   : > { %v856_v49 = vadd.f32 %v848_v44, %v840_v43  ;;  %v841_v50 = vmax.f32 %v824_v48, 0.0  ;;  %1620 = vmatprep.subr.bf16.mxu0 %v870_v35 }
 0x313   : > { %v859_v52 = vadd.f32 %v851_v47, %v843_v46 }
 0x314   : > { %v857_v53 = vadd.f32 %v849_v51, %v841_v50 }
 0x315   : > { %1621 = vmatpush3.bf16.msra.mxu0 %v870_v35  ;;  %v872_v54 = vpack.c.bf16 %v859_v52, %v858_v42 }
 0x316   : > { %v871_v55 = vpack.c.bf16 %v857_v53, %v856_v49  ;;  %v1771_v53 = vld [vmem:[%s2166_s4 + $0x28] sm:$0xff]  }
 0x318   : > { %1622 = vmatprep.subr.bf16.mxu0 %v871_v55 }
 0x319   : > { %1623 = vmatpush3.bf16.msra.mxu0 %v871_v55 }
 0x31a   : > { %1624 = vmatprep.subr.bf16.mxu0 %v872_v54 }
 0x31d   : > { %1625 = vmatpush3.bf16.msra.mxu0 %v872_v54 }
 0x320   : > { %1627 = vmatmul.mubr.msk.bf16.vlgmr.msra.gmra.mrb[16].mxu0 %vm624_vm1, %v1763_v56 }
 0x321   : > { %1630 = vmatprep.mubr.msk.bf16.mxu0 %vm624_vm1, %v1764_v57 }
 0x328   : > { %1631 = vmatmul.mubr.msk.bf16.gmra.mrb[20].mxu0 %vm624_vm1, %v1765_v58 }
 0x329   : > { %1654 = vmatprep.mubr.msk.bf16.mxu0 %vm1000_vm5, %v1770_v33 }
 0x3f3   : > { %v1628_v63 = vpop.f32.mrb[16].mxu0 }
 0x3f4   : > { %v939_v2 = vpop.f32.mrb[17].mxu0 }
 0x3f5   : > { %v1629_v3 = vpop.f32.mrb[18].mxu0 }
 0x3f6   : > { %v942_v4 = vpop.f32.mrb[19].mxu0 }
 0x3fb   : > { %v1632_v6 = vpop.f32.mrb[20].mxu0 }
 0x3fc   : > { %v978_v7 = vsel %vm975_vm7, %v1628_v63, %v1632_v6  ;;  %v955_v8 = vpop.f32.mrb[21].mxu0 }
 0x3fd   : > { %v976_v9 = vsel %vm975_vm7, %v939_v2, %v955_v8  ;;  %v1633_v10 = vpop.f32.mrb[22].mxu0  ;;  %v982_v13 = vmax.f32 %v978_v7, 0.0  ;;  %v1228_v8 = vld [vmem:[%s2167_s5] sm:$0xf] }
 0x3fe   : > { %v979_v11 = vsel %vm975_vm7, %v1629_v3, %v1633_v10  ;;  %v958_v12 = vpop.f32.mrb[23].mxu0  ;;  %v980_v16 = vmax.f32 %v976_v9, 0.0 }
 0x3ff   : > { %v983_v14 = vmax.f32 %v979_v11, 0.0  ;;  %v977_v15 = vsel %vm975_vm7, %v942_v4, %v958_v12 }
 0x400   : > { %v981_v17 = vmax.f32 %v977_v15, 0.0 }
 0x401   : > { %v989_v18 = vpack.c.bf16 %v983_v14, %v982_v13 }
 0x402   : > { %v988_v19 = vpack.c.bf16 %v981_v17, %v980_v16 }
 0x404   : > { %1634 = vmatprep.subr.bf16.mxu1 %v988_v19 }
 0x405   : > { %1635 = vmatpush3.bf16.msra.mxu1 %v988_v19 }
 0x406   : > { %1636 = vmatprep.subr.bf16.mxu1 %v989_v18 }
 0x409   : > { %1637 = vmatpush3.bf16.msra.mxu1 %v989_v18 }
 0x40c   : > { %1639 = vmatmul.mubr.msk.bf16.vlgmr.msra.gmra.mrb[12].mxu1 %vm1000_vm5, %v1767_v20 }
 0x40d   : > { %1646 = vmatprep.mubr.msk.bf16.mxu1 %vm1000_vm5, %v1768_v21 }
 0x4df   : > { %v1640_v22 = vpop.f32.mrb[12].mxu1 }
 0x4e0   : > { %v1041_v23 = vpop.f32.mrb[13].mxu1  ;;  %v1058_v25 = vmax.f32 %v1640_v22, 0.0 }
 0x4e1   : > { %v1641_v24 = vpop.f32.mrb[14].mxu1  ;;  %v1056_v28 = vmax.f32 %v1041_v23, 0.0 }
 0x4e2   : > { %v1059_v26 = vmax.f32 %v1641_v24, 0.0  ;;  %v1044_v27 = vpop.f32.mrb[15].mxu1  ;;  %v1138_v35 = vmul.f32 0.4, %v1058_v25 }
 0x4e3   : > { %v1057_v29 = vmax.f32 %v1044_v27, 0.0  ;;  %v1136_v39 = vmul.f32 0.4, %v1056_v28 }
 0x4e4   : > { %v1066_v30 = vpack.c.bf16 %v1059_v26, %v1058_v25  ;;  %v1139_v43 = vmul.f32 0.4, %v1059_v26 }
 0x4e5   : > { %v1065_v31 = vpack.c.bf16 %v1057_v29, %v1056_v28  ;;  %v1137_v46 = vmul.f32 0.4, %v1057_v29 }
 0x4e7   : > { %1642 = vmatprep.subr.bf16.mxu1 %v1065_v31 }
 0x4e8   : > { %1643 = vmatpush3.bf16.msra.mxu1 %v1065_v31 }
 0x4e9   : > { %1644 = vmatprep.subr.bf16.mxu1 %v1066_v30 }
 0x4ec   : > { %1645 = vmatpush3.bf16.msra.mxu1 %v1066_v30 }
 0x4ed   : > { %1658 = vmatprep.subr.bf16.mxu1 %v1838_v38 }
 0x4ef   : > { %1647 = vmatmul.mubr.msk.bf16.vlgmr.msra.gmra.mrb[16].mxu1 %vm1000_vm5, %v1769_v32 }
 0x4f0   : > { %1662 = vmatprep.mubr.msk.bf16.mxu1 %vm1837_vm4, %v1838_v38 }
 0x5c2   : > { %v1648_v34 = vpop.f32.mrb[16].mxu1 }
 0x5c3   : > { %v1134_v36 = vmax.f32 %v1648_v34, 0.0  ;;  %v1117_v37 = vpop.f32.mrb[17].mxu1 }
 0x5c4   : > { %v1132_v40 = vmax.f32 %v1117_v37, 0.0  ;;  %v1649_v41 = vpop.f32.mrb[18].mxu1 }
 0x5c5   : > { %v1142_v44 = vadd.f32 %v1138_v35, %v1134_v36  ;;  %v1135_v45 = vmax.f32 %v1649_v41, 0.0  ;;  %v1120_v42 = vpop.f32.mrb[19].mxu1 }
 0x5c6   : > { %v1140_v47 = vadd.f32 %v1136_v39, %v1132_v40  ;;  %v1133_v48 = vmax.f32 %v1120_v42, 0.0 }
 0x5c7   : > { %v1143_v49 = vadd.f32 %v1139_v43, %v1135_v45  ;;  %v1222_v56 = vmul.f32 0.4, %v1142_v44 }
 0x5c8   : > { %v1141_v50 = vadd.f32 %v1137_v46, %v1133_v48  ;;  %v1220_v59 = vmul.f32 0.4, %v1140_v47 }
 0x5c9   : > { %v1150_v51 = vpack.c.bf16 %v1143_v49, %v1142_v44  ;;  %v1223_v63 = vmul.f32 0.4, %v1143_v49 }
 0x5ca   : > { %v1149_v52 = vpack.c.bf16 %v1141_v50, %v1140_v47  ;;  %v1221_v3 = vmul.f32 0.4, %v1141_v50 }
 0x5cc   : > { %1650 = vmatprep.subr.bf16.mxu0 %v1149_v52 }
 0x5cd   : > { %1651 = vmatpush3.bf16.msra.mxu0 %v1149_v52 }
 0x5ce   : > { %1652 = vmatprep.subr.bf16.mxu0 %v1150_v51 }
 0x5d1   : > { %1653 = vmatpush3.bf16.msra.mxu0 %v1150_v51 }
 0x5d4   : > { %1655 = vmatmul.mubr.msk.bf16.vlgmr.msra.gmra.mrb[24].mxu0 %vm1000_vm5, %v1771_v53 }
 0x6a7   : > { %v1656_v54 = vpop.f32.mrb[24].mxu0 }
 0x6a8   : > { %v1218_v55 = vmax.f32 %v1656_v54, 0.0  ;;  %v1201_v57 = vpop.f32.mrb[25].mxu0 }
 0x6a9   : > { %v1216_v58 = vmax.f32 %v1201_v57, 0.0  ;;  %v1657_v60 = vpop.f32.mrb[26].mxu0 }
 0x6aa   : > { %v1226_v61 = vadd.f32 %v1222_v56, %v1218_v55  ;;  %v1219_v62 = vmax.f32 %v1657_v60, 0.0  ;;  %v1204_v0 = vpop.f32.mrb[27].mxu0 }
 0x6ab   : > { %v1224_v1 = vadd.f32 %v1220_v59, %v1216_v58  ;;  %v1217_v2 = vmax.f32 %v1204_v0, 0.0 }
 0x6ac   : > { %v1227_v4 = vadd.f32 %v1223_v63, %v1219_v62 }
 0x6ad   : > { %v1225_v5 = vadd.f32 %v1221_v3, %v1217_v2 }
 0x6ae   : > { %v1230_v6 = vpack.c.bf16 %v1227_v4, %v1226_v61 }
 0x6af   : > { %v1229_v7 = vpack.c.bf16 %v1225_v5, %v1224_v1 }
 0x6b1   : > { %1659 = vmatpush3.bf16.msra.mxu1 %v1229_v7 }
 0x6b2   : > { %1660 = vmatprep.subr.bf16.mxu1 %v1838_v38 }
 0x6b5   : > { %1661 = vmatpush3.bf16.msra.mxu1 %v1230_v6 }
 0x6b8   : > { %1663 = vmatmul.mubr.msk.bf16.vlgmr.msra.gmra.mrb[20].mxu1 %vm1000_vm5, %v1228_v8 }
 0x78b   : > { %v1268_v38 = vpop.f32.mrb[20].mxu1 }
 0x78c   : > { %1274 = vst [vmem:[%s261_s20] sm:$0xff] %v1268_v38  ;;  %v1664_v9 = vpop.f32.mrb[21].mxu1 }
 0x78d   : > { %v1271_v10 = vpop.f32.mrb[22].mxu1 }
 0x78e   : > { %1785 = shalt.err (!%p1782_p3)
}
 0x78f   : > { %s1786_s15 = scalar_lea.hbm %s2122_s11, 128  ;;  %s1790_s18 = scalar_lea.hbm %s2168_s6, 256 }
 0x790   : > { %p1787_p4 = scmp.ne.s32.totalorder %s2122_s11, %s1786_s15  ;;  %p1791_p9 = scmp.lt.u32.totalorder %s2122_s11, %s2168_s6 }
 0x791   : > { %p1792_p10 = scmp.lt.u32.totalorder %s1790_s18, %s1786_s15  ;;  %p1794_p12 = scmp.lt.u32.totalorder %s1786_s15, %s2122_s11 }
 0x792   : > { %p1788_p7 = pnand %p1787_p4, %p1915_p5 }
 0x793   : > { %p1793_p11 = por %p1792_p10, %p1791_p9 }
 0x794   : > { %p1789_p8 = pneg %p1788_p7 }
 0x795   : > { %p1795_p13 = por %p1794_p12, %p1793_p11 }
 0x797   : > { %p1796_p0 = pnand %p1795_p13, %p1789_p8 }
 0x799   : > { %1799 = shalt.err (!%p1796_p0)
}
 0x79a   : > { %1706 = dma.vmem_to_hbm [thread:$0]  (%p1915_p5), %s2117_s26, 128, %s2122_s11, %s1276_s13   ;;  %v1665_v11 = vpop.f32.mrb[23].mxu1 }
 0x79b PF: > { %p1712_p1 = scmp.ge.s32.totalorder %s1834_s24, 2  ;;  %s1301_s28 = sand.u32 1, %s1822_s21  }
 0x79c   : > { %s1302_s29 = scalar_lea.sflag [#allocation3], %s1301_s28 }
 0x79d   : > { %p1709_p2 = pnand %p1712_p1, %p1919_p6 }
 0x79f   : > { %1817 = dma.done.wait (!%p1709_p2), %s1302_s29, 128  }
 0x7a0   : > { %1819 = vsyncadd (!%p1709_p2), %s1302_s29, 4294967168  ;;  %p16_p3 = scmp.ge.s32.totalorder %s1902_s27, 4   ;;  %s2173_s21 = smov %s1826_s22 }
 0x7a1   : > { %s2174_s22 = smov %s1830_s23  ;;  %s2175_s23 = smov %s1913_s30 }
 0x7a2   : > { %s2176_s24 = smov %s1902_s27  ;;  %18 = sbr.rel (!%p16_p3) target bundleno = 3 (0x3), region = 86 }
 0x7a9   :  { %1307 = vsyncpa [#allocation3], 1 }
 0x7aa   :  { %1309 = vsyncpa [#allocation3 + $0x1], 1 }

</bundles_post_ra>
